<compile_context>
chip_gen: v7x
topology: tpu7x:2x2x1
jax: 0.10.0
libtpu: 0.0.40
codegen_flags: <defaults>
</compile_context>

<pallas_src>
import functools
import math

import jax
import jax.numpy as jnp
from jax.experimental import pallas as pl
from jax.experimental.pallas import tpu as pltpu


_VMEM_LIMIT = 48 * 1024 * 1024  # > v5e/v6e/v7x default scoped limit, < v7x physical


def _round_up(x, m):
    return ((x + m - 1) // m) * m


def _pad_2d(a, rows, cols):
    r, c = a.shape
    if r == rows and c == cols:
        return a
    return jnp.pad(a, ((0, rows - r), (0, cols - c)))


# ----------------------------- Pallas kernels ------------------------------

def _make_fused_linear_kernel(has_ln, activation, has_residual):
    """(optional LN over K) -> x @ w -> +bias -> (QuickGELU) -> (+residual)."""

    def kernel(*refs):
        it = iter(refs)
        x_ref = next(it)
        g_ref = next(it) if has_ln else None
        bln_ref = next(it) if has_ln else None
        w_ref = next(it)
        b_ref = next(it)
        r_ref = next(it) if has_residual else None
        o_ref = next(it)

        xv = x_ref[...]
        if has_ln:
            xf = xv.astype(jnp.float32)
            mu = jnp.mean(xf, axis=-1, keepdims=True)
            var = jnp.mean(jnp.square(xf - mu), axis=-1, keepdims=True)
            xf = (xf - mu) * jax.lax.rsqrt(var + 1e-5)
            xv = xf * g_ref[...].astype(jnp.float32) + bln_ref[...].astype(jnp.float32)

        acc = jnp.dot(xv.astype(w_ref.dtype), w_ref[...],
                      preferred_element_type=jnp.float32)
        acc = acc + b_ref[...].astype(jnp.float32)
        if activation == "quickgelu":
            acc = acc * jax.nn.sigmoid(1.702 * acc)   # CLIP QuickGELU, fused
        if has_residual:
            acc = acc + r_ref[...].astype(jnp.float32)
        o_ref[...] = acc.astype(o_ref.dtype)

    return kernel


def _add_pos_kernel(x_ref, p_ref, o_ref):
    o_ref[...] = (x_ref[...].astype(jnp.float32)
                  + p_ref[...].astype(jnp.float32)).astype(o_ref.dtype)


def _attention_kernel(qkv_ref, o_ref, *, num_heads, head_dim, scale):
    """Causal SDPA for one batch element; all heads handled in one grid step.

    qkv block: (1, S, 3*D) read directly from the fused QKV projection —
    the per-head column slices replace the HBM head-split transposes.
    Output block: (1, S, D), lane-dense (last dim = D).
    """
    qkv = qkv_ref[0]                       # (S, 3D), bf16
    S = qkv.shape[0]
    D = num_heads * head_dim

    row = jax.lax.broadcasted_iota(jnp.int32, (S, S), 0)
    col = jax.lax.broadcasted_iota(jnp.int32, (S, S), 1)
    causal = col <= row                    # built once, reused for every head

    outs = []
    for h in range(num_heads):             # static unroll; H is small
        q = qkv[:, h * head_dim:(h + 1) * head_dim]
        k = qkv[:, D + h * head_dim:D + (h + 1) * head_dim]
        v = qkv[:, 2 * D + h * head_dim:2 * D + (h + 1) * head_dim]
        s = jax.lax.dot_general(q, k, (((1,), (1,)), ((), ())),
                                preferred_element_type=jnp.float32) * scale
        s = jnp.where(causal, s, -jnp.inf)
        m = jnp.max(s, axis=-1, keepdims=True)
        p = jnp.exp(s - m)
        denom = jnp.sum(p, axis=-1, keepdims=True)
        p = p * pl.reciprocal(denom, approx=True)      # divide on the EUP slot
        outs.append(jnp.dot(p.astype(v.dtype), v,
                            preferred_element_type=jnp.float32))
    o_ref[0] = jnp.concatenate(outs, axis=-1).astype(o_ref.dtype)


# ------------------------------ Pallas wrappers -----------------------------

def fused_linear(x, w, b=None, *, ln=None, activation=None, residual=None,
                 out_dtype=None):
    """y = (LN(x) if ln else x) @ w + b (+QuickGELU) (+residual).

    x: (M, K);  w: (K, N) (pre-transposed, bf16);  b: (N,) or None;
    ln: optional (gamma, beta) each (K,);  residual: optional (M, N).
    Grid is (M tiles, N tiles); K is kept whole per block (needed for the
    fused LayerNorm; a (K, 256) bf16 weight slab is only a few MiB even for
    CLIP's 4*D hidden).
    """
    M, K = x.shape
    N = w.shape[1]
    out_dtype = out_dtype if out_dtype is not None else x.dtype
    if b is None:
        b = jnp.zeros((N,), jnp.float32)

    # Large M tile (amortizes per-step overhead, feeds the MXU full height),
    # padded so every block is a multiple of 8 sublanes.
    TM = min(256, _round_up(M, 8))
    Mp = _round_up(M, TM)
    # N: full when small (full-dim blocks are always legal), else 256-wide
    # lane-dense slabs so stores are unmasked and weight slabs stay small.
    if N <= 512:
        TN, Np = N, N
    else:
        TN = 256
        Np = _round_up(N, TN)

    xp = _pad_2d(x, Mp, K)
    wp = _pad_2d(w, K, Np)
    bp = _pad_2d(b.reshape(1, N).astype(jnp.float32), 1, Np)

    in_specs = [pl.BlockSpec((TM, K), lambda i, j: (i, 0))]
    args = [xp]
    if ln is not None:
        g, beta = ln
        in_specs += [pl.BlockSpec((1, K), lambda i, j: (0, 0)),
                     pl.BlockSpec((1, K), lambda i, j: (0, 0))]
        args += [g.reshape(1, K).astype(jnp.float32),
                 beta.reshape(1, K).astype(jnp.float32)]
    in_specs += [pl.BlockSpec((K, TN), lambda i, j: (0, j)),
                 pl.BlockSpec((1, TN), lambda i, j: (0, j))]
    args += [wp, bp]
    if residual is not None:
        in_specs.append(pl.BlockSpec((TM, TN), lambda i, j: (i, j)))
        args.append(_pad_2d(residual, Mp, Np))

    kernel = _make_fused_linear_kernel(ln is not None, activation,
                                       residual is not None)
    out = pl.pallas_call(
        kernel,
        out_shape=jax.ShapeDtypeStruct((Mp, Np), out_dtype),
        grid=(Mp // TM, Np // TN),
        in_specs=in_specs,
        out_specs=pl.BlockSpec((TM, TN), lambda i, j: (i, j)),
        compiler_params=pltpu.CompilerParams(
            dimension_semantics=("parallel", "parallel"),
            vmem_limit_bytes=_VMEM_LIMIT),
    )(*args)
    if Mp != M or Np != N:
        out = out[:M, :N]
    return out


def add_positional(x, pos, out_dtype):
    """x + pos (broadcast over batch), also converts to the compute dtype."""
    B, S, D = x.shape
    return pl.pallas_call(
        _add_pos_kernel,
        out_shape=jax.ShapeDtypeStruct((B, S, D), out_dtype),
        grid=(B,),
        in_specs=[pl.BlockSpec((1, S, D), lambda b: (b, 0, 0)),
                  pl.BlockSpec((S, D), lambda b: (0, 0))],
        out_specs=pl.BlockSpec((1, S, D), lambda b: (b, 0, 0)),
        compiler_params=pltpu.CompilerParams(
            dimension_semantics=("parallel",),
            vmem_limit_bytes=_VMEM_LIMIT),
    )(x, pos)


def pallas_attention(qkv, num_heads):
    """Causal multi-head attention straight from the fused (B, S, 3D) QKV."""
    B, S, D3 = qkv.shape
    D = D3 // 3
    Dh = D // num_heads
    kernel = functools.partial(_attention_kernel, num_heads=num_heads,
                               head_dim=Dh, scale=1.0 / math.sqrt(Dh))
    return pl.pallas_call(
        kernel,
        out_shape=jax.ShapeDtypeStruct((B, S, D), qkv.dtype),
        grid=(B,),
        in_specs=[pl.BlockSpec((1, S, D3), lambda b: (b, 0, 0))],
        out_specs=pl.BlockSpec((1, S, D), lambda b: (b, 0, 0)),
        compiler_params=pltpu.CompilerParams(
            dimension_semantics=("parallel",),
            vmem_limit_bytes=_VMEM_LIMIT),
    )(qkv)


# ------------------------- Transformer building blocks ----------------------

def residual_attention_block(x, p, num_heads):
    """CLIP ResidualAttentionBlock: x += attn(ln_1(x)); x += mlp(ln_2(x))."""
    B, S, D = x.shape
    x2 = x.reshape(B * S, D)
    # LN1 fused into the QKV projection.
    qkv = fused_linear(x2, p["in_proj_w"], p["in_proj_b"],
                       ln=(p["ln_1_g"], p["ln_1_b"]))               # (B*S, 3D)
    attn = pallas_attention(qkv.reshape(B, S, 3 * D), num_heads)    # (B, S, D)
    # Output projection with the residual add fused into its epilogue.
    x2 = fused_linear(attn.reshape(B * S, D), p["out_proj_w"], p["out_proj_b"],
                      residual=x2)
    # LN2 fused into fc1 (+ QuickGELU); fc2 fuses the second residual add.
    h = fused_linear(x2, p["fc_w"], p["fc_b"],
                     ln=(p["ln_2_g"], p["ln_2_b"]), activation="quickgelu")
    x2 = fused_linear(h, p["proj_w"], p["proj_b"], residual=x2)
    return x2.reshape(B, S, D)


def text_encoder_forward(x, tokenized_prompts, params):
    """Mirrors TextEncoder.forward.  x: (B, S, D) prompt embeddings (f32)."""
    B, S, D = x.shape
    x = add_positional(x, params["pos_emb"], jnp.bfloat16)     # (B,S,D) bf16
    # permute(1,0,2) round-trip is layout-only -> folded away (BSD kept).
    for layer_p in params["layers"]:
        x = residual_attention_block(x, layer_p, params["num_heads"])
    # EOT pooling: CLIP convention — argmax over raw token ids picks the EOT
    # token (it has the highest id).  LayerNorm is row-wise, so gathering the
    # EOT rows first and applying ln_final afterwards is exactly equivalent;
    # ln_final is then fused into the text-projection matmul.
    eot = jnp.argmax(tokenized_prompts, axis=-1)               # (B,) glue gather
    pooled = x[jnp.arange(B), eot]                             # (B, D)
    return fused_linear(pooled, params["text_projection"], None,
                        ln=(params["ln_final_g"], params["ln_final_b"]),
                        out_dtype=jnp.float32)                 # (B, proj_dim)


# ------------------------------ Parameter setup -----------------------------

def init_params(key, seq_len, d_model, num_heads, num_layers, proj_dim):
    def nxt():
        nonlocal key
        key, sub = jax.random.split(key)
        return sub

    std = 0.02
    f32, bf16 = jnp.float32, jnp.bfloat16

    def linear_w(n_in, n_out):
        # PyTorch nn.Linear stores (out, in); here the weight is kept
        # pre-transposed to (in, out) and cast to bf16 once at init.
        return (std * jax.random.normal(nxt(), (n_in, n_out), f32)).astype(bf16)

    def vec(n, scale=std):
        return scale * jax.random.normal(nxt(), (n,), f32)

    params = {
        "num_heads": num_heads,
        "pos_emb": std * jax.random.normal(nxt(), (seq_len, d_model), f32),
        "ln_final_g": 1.0 + 0.1 * jax.random.normal(nxt(), (d_model,), f32),
        "ln_final_b": vec(d_model, 0.1),
        "text_projection": linear_w(d_model, proj_dim),
        "layers": [],
    }
    for _ in range(num_layers):
        params["layers"].append({
            "ln_1_g": 1.0 + 0.1 * jax.random.normal(nxt(), (d_model,), f32),
            "ln_1_b": vec(d_model, 0.1),
            "in_proj_w": linear_w(d_model, 3 * d_model),
            "in_proj_b": vec(3 * d_model),
            "out_proj_w": linear_w(d_model, d_model),
            "out_proj_b": vec(d_model),
            "ln_2_g": 1.0 + 0.1 * jax.random.normal(nxt(), (d_model,), f32),
            "ln_2_b": vec(d_model, 0.1),
            "fc_w": linear_w(d_model, 4 * d_model),
            "fc_b": vec(4 * d_model),
            "proj_w": linear_w(4 * d_model, d_model),
            "proj_b": vec(d_model),
        })
    return params, key


# --------------------------- Pure-JAX reference ------------------------------

def reference_forward(x, tokenized_prompts, params):
    """f32 reference using the same (bf16-quantized) weights."""
    f32 = jnp.float32
    H = params["num_heads"]
    B, S, D = x.shape
    Dh = D // H

    def ln(v, g, b):
        mu = v.mean(-1, keepdims=True)
        var = ((v - mu) ** 2).mean(-1, keepdims=True)
        return (v - mu) * jax.lax.rsqrt(var + 1e-5) * g.astype(f32) + b.astype(f32)

    x = x.astype(f32) + params["pos_emb"].astype(f32)[None]
    mask = jnp.tril(jnp.ones((S, S), bool))
    for p in params["layers"]:
        h = ln(x, p["ln_1_g"], p["ln_1_b"])
        qkv = h @ p["in_proj_w"].astype(f32) + p["in_proj_b"].astype(f32)
        q, k, v = jnp.split(qkv, 3, axis=-1)
        q = q.reshape(B, S, H, Dh).transpose(0, 2, 1, 3)
        k = k.reshape(B, S, H, Dh).transpose(0, 2, 1, 3)
        v = v.reshape(B, S, H, Dh).transpose(0, 2, 1, 3)
        s = jnp.einsum("bhqd,bhkd->bhqk", q, k) / math.sqrt(Dh)
        s = jnp.where(mask, s, -jnp.inf)
        attn = jnp.einsum("bhqk,bhkd->bhqd", jax.nn.softmax(s, axis=-1), v)
        attn = attn.transpose(0, 2, 1, 3).reshape(B, S, D)
        x = x + attn @ p["out_proj_w"].astype(f32) + p["out_proj_b"].astype(f32)
        h = ln(x, p["ln_2_g"], p["ln_2_b"])
        h = h @ p["fc_w"].astype(f32) + p["fc_b"].astype(f32)
        h = h * jax.nn.sigmoid(1.702 * h)
        x = x + h @ p["proj_w"].astype(f32) + p["proj_b"].astype(f32)
    x = ln(x, params["ln_final_g"], params["ln_final_b"])
    eot = jnp.argmax(tokenized_prompts, axis=-1)
    pooled = x[jnp.arange(B), eot]
    return pooled @ params["text_projection"].astype(f32)


# ----------------------------------- main ------------------------------------

if __name__ == "__main__":
    B, S, D, H, L, P = 2, 8, 32, 4, 2, 64   # batch, seq, width, heads, layers, proj
    key = jax.random.PRNGKey(0)
    params, key = init_params(key, S, D, H, L, P)
    kx, kt = jax.random.split(key)
    x = jax.random.normal(kx, (B, S, D), dtype=jnp.float32)        # prompt embeddings
    tokenized_prompts = jax.random.randint(kt, (B, S), 0, 1000, dtype=jnp.int32)

    out = jax.block_until_ready(text_encoder_forward(x, tokenized_prompts, params))
    ref = jax.block_until_ready(reference_forward(x, tokenized_prompts, params))

    assert out.shape == (B, P) and out.dtype == jnp.float32
    assert bool(jnp.all(jnp.isfinite(out)))
    max_err = float(jnp.max(jnp.abs(out - ref)))
    assert max_err < 5e-2, f"max abs error vs reference: {max_err}"
    print("KERNEL_OK")
</pallas_src>

<mosaic_0001>
module attributes {stable_mosaic.version = 11 : i64} {
  func.func @_add_pos_kernel(%arg0: i32, %arg1: memref<1x8x32xf32, #tpu.memory_space<vmem>>, %arg2: memref<8x32xf32, #tpu.memory_space<vmem>>, %arg3: memref<1x8x32xbf16, #tpu.memory_space<vmem>>) attributes {dimension_semantics = [#tpu.dimension_semantics<parallel>], iteration_bounds = array<i64: 2>, scalar_prefetch = 0 : i64, scratch_operands = 0 : i64, tpu.core_type = #tpu.core_type<tc>, window_params = [{transform_indices = @transform_0, window_bounds = array<i64: 1, 8, 32>}, {pipeline_mode = #tpu.pipeline_mode<synchronous>, transform_indices = @transform_1, window_bounds = array<i64: 8, 32>}, {transform_indices = @transform_2, window_bounds = array<i64: 1, 8, 32>}]} {
    %c0 = arith.constant 0 : index
    %c0_0 = arith.constant 0 : index
    %c0_1 = arith.constant 0 : index
    %0 = vector.load %arg1[%c0, %c0_0, %c0_1] : memref<1x8x32xf32, #tpu.memory_space<vmem>>, vector<1x8x32xf32>
    %c0_2 = arith.constant 0 : index
    %c0_3 = arith.constant 0 : index
    %1 = vector.load %arg2[%c0_2, %c0_3] : memref<8x32xf32, #tpu.memory_space<vmem>>, vector<8x32xf32>
    %2 = vector.shape_cast %1 : vector<8x32xf32> to vector<1x8x32xf32>
    %3 = arith.addf %0, %2 : vector<1x8x32xf32>
    %4 = arith.truncf %3 : vector<1x8x32xf32> to vector<1x8x32xbf16>
    %c0_4 = arith.constant 0 : index
    %c0_5 = arith.constant 0 : index
    %c0_6 = arith.constant 0 : index
    %5 = vector.load %arg3[%c0_4, %c0_5, %c0_6] : memref<1x8x32xbf16, #tpu.memory_space<vmem>>, vector<1x8x32xbf16>
    tpu.vector_store %arg3[%c0_4, %c0_5, %c0_6], %4 {strides = array<i32>} : memref<1x8x32xbf16, #tpu.memory_space<vmem>>, vector<1x8x32xbf16>,
    return
  }
  func.func @transform_0(%arg0: i32) -> (i32, i32, i32) {
    %c0_i32 = arith.constant 0 : i32
    %c0_i32_0 = arith.constant 0 : i32
    %c0_i32_1 = arith.constant 0 : i32
    return %arg0, %c0_i32, %c0_i32_0 : i32, i32, i32
  }
  func.func @transform_1(%arg0: i32) -> (i32, i32) {
    %c0_i32 = arith.constant 0 : i32
    %c0_i32_0 = arith.constant 0 : i32
    %c0_i32_1 = arith.constant 0 : i32
    return %c0_i32, %c0_i32_0 : i32, i32
  }
  func.func @transform_2(%arg0: i32) -> (i32, i32, i32) {
    %c0_i32 = arith.constant 0 : i32
    %c0_i32_0 = arith.constant 0 : i32
    %c0_i32_1 = arith.constant 0 : i32
    return %arg0, %c0_i32, %c0_i32_0 : i32, i32, i32
  }
}

</mosaic_0001>

<bundles_post_ra>
// kernel: tpu_custom_call.1
= control target key start
LH: loop header
LB: loop body
LE: loop exit
PB: predicated region body
PF: predicated region fallthrough
CT: control target
= control target key end

     0   :  { %7 = vsyncpa [#allocation3], 0  ;;  %s693_s0 = inlined_call_operand.hbm [shape: f32[2,8,32], index: 0, kind: input, shape index: {}]   ;;  %s694_s1 = inlined_call_operand.hbm [shape: f32[8,32], index: 1, kind: input, shape index: {}]   ;;  %s695_s2 = inlined_call_operand.hbm [shape: bf16[2,8,32], index: 2, kind: output, shape index: {}]  }
   0x1   :  { %9 = vsyncpa [#allocation3 + $0x1], 0 }
   0x2   :  { %10 = vsyncpa [#allocation6], 0 }
   0x3   :  { %11 = vsyncpa [#allocation4], 0 }
   0x4   :  { %13 = vsyncpa [#allocation4 + $0x1], 0  ;;  %s491_s9 = smov 0   ;;  %s493_s10 = smov 0  }
   0x5   :  { %s495_s11 = smov 0   ;;  %s497_s12 = smov 0  }
   0x6 LB: > { %s512_s13 = sadd.s32 4294967295, %s471_s12   ;;  %s272_s14 = sadd.s32 4294967294, %s471_s12   ;;  %s471_s12 = sphi %s497_s12, %s719_s12   ;;  %s467_s11 = sphi %s495_s11, %s718_s11   ;;  %s463_s10 = sphi %s493_s10, %s717_s10   ;;  %s459_s9 = sphi %s491_s9, %s716_s9  }
   0x7   : > { %p39_p0 = scmp.ne.s32.totalorder %s463_s10, %s459_s9  ;;  %p696_p1 = scmp.eq.s32.totalorder %s512_s13, 0 }
   0x8   : > { %p90_p3 = scmp.eq.s32.totalorder %s272_s14, 1  ;;  %p273_p5 = scmp.ge.s32.totalorder %s471_s12, 1 }
   0x9   : > { %p521_p4 = por %p696_p1, %p39_p0  ;;  %p97_p7 = scmp.lt.s32.totalorder %s471_s12, 3 }
   0xa   : > { %p526_p6 = por %p90_p3, %p39_p0  ;;  %s473_s18 = smov [#allocation5]  }
   0xb   : > { %s699_s15 = scalar_select %p521_p4, 1, 0 }
   0xc   : > { %s700_s16 = scalar_select %p526_p6, 1, 0 }
   0xd   : > { %p531_p8 = pnand %p273_p5, %p97_p7  ;;  %s110_s19 = sshll.u32 %s473_s18, 4  ;;  %s111_s19 = int_to_ptr.vmem [resolvable:$true] %s110_s19 }
   0xe   : > { %s539_s20 = sadd.s32 1, %s471_s12   ;;  %s26_s24 = sadd.s32 1, %s467_s11 }
   0xf   : > { %s701_s17 = scalar_select %p531_p8, 1, 0 }
  0x10   : > { %p294_p10 = pneg %p531_p8  ;;  %s23_s22 = ssub.s32 %s471_s12, %s539_s20 }
  0x11   : > { %p549_p12 = scmp.eq.s32.totalorder %s23_s22, 0  ;;  %s343_s27 = scalar_lea.hbm %s694_s1, 128 }
  0x12   : > { %p543_p11 = pnand %p294_p10, %p696_p1  ;;  %p344_p0 = scmp.ne.s32.totalorder %s694_s1, %s343_s27 }
  0x13   : > { %s703_s23 = scalar_select %p549_p12, 1, 0 }
  0x14   : > { %p345_p3 = pneg %p543_p11  ;;  %p350_p10 = scmp.lt.u32.totalorder %s343_s27, %s694_s1 }
  0x16   : > { %p346_p5 = pnand %p345_p3, %p344_p0 }
  0x18   : > { %p347_p7 = pneg %p346_p5 }
  0x1a   : > { %p352_p9 = pnand %p350_p10, %p347_p7 }
  0x1c   : > { %355 = shalt.err (!%p352_p9)
}
  0x1d   : > { %s356_s4 = scalar_lea.vmem %s111_s19, 128  ;;  %p364_p6 = scmp.lt.s32.totalorder %s111_s19, %s111_s19 }
  0x1e   : > { %p357_p1 = scmp.ne.s32.totalorder %s111_s19, %s356_s4  ;;  %p365_p4 = scmp.lt.s32.totalorder %s356_s4, %s356_s4 }
  0x20   : > { %p359_p2 = pnand %p357_p1, %p345_p3  ;;  %p366_p8 = por %p365_p4, %p364_p6 }
  0x22   : > { %p360_p13 = pneg %p359_p2 }
  0x24   : > { %p367_p12 = pnand %p366_p8, %p360_p13 }
  0x26   : > { %370 = shalt.err (!%p367_p12)
}
  0x27   : > { %297 = dma.hbm_to_vmem [thread:$0]  (!%p543_p11), %s694_s1, 128, %s111_s19, [#allocation6]  }
  0x28   : > { %p704_p1 = scmp.ne.s32.totalorder %s703_s23, 0  ;;  %p34_p2 = scmp.eq.s32.totalorder %s471_s12, 0 }
  0x29   : > { %p705_p4 = scmp.ne.s32.totalorder %s467_s11, %s463_s10  ;;  %p706_p6 = scmp.eq.s32.totalorder %s512_s13, 1 }
  0x2a   : > { %s575_s7 = scalar_select %p704_p1, %s467_s11, %s26_s24  }
  0x2b   : > { %p583_p8 = por %p706_p6, %p705_p4  ;;  %p307_p9 = scmp.lt.s32.totalorder %s471_s12, 2 }
  0x2c   : > { %s121_s14 = sand.u32 1, %s467_s11   ;;  %p708_p12 = pmov %p705_p4 }
  0x2d   : > { %s276_s18 = sshll.u32 %s121_s14, 3  ;;  %s277_s21 = sshll.u32 %s471_s12, 7 }
  0x2e   : > { %p35_p13 = por %p34_p2, %p708_p12  ;;  %s596_s19 = scalar_lea.hbm %s693_s0, %s277_s21 }
  0x2f   : > { %s125_s23 = scalar_lea.vmem [#allocation2], %s276_s18  ;;  %s122_s27 = scalar_lea.sflag [#allocation3], %s121_s14 }
  0x30   : > { %s132_s24 = sshll.u32 %s125_s23, 4  ;;  %p598_p11 = pnand %p307_p9, %p35_p13  ;;  %s602_s24 = int_to_ptr.vmem [resolvable:$true] %s132_s24 }
  0x31   : > { %s371_s28 = scalar_lea.hbm %s596_s19, 128  ;;  %s376_s3 = scalar_lea.hbm %s693_s0, 256 }
  0x32   : > { %p372_p0 = scmp.ne.s32.totalorder %s596_s19, %s371_s28  ;;  %p373_p3 = pneg %p598_p11 }
  0x33   : > { %p377_p10 = scmp.lt.u32.totalorder %s596_s19, %s693_s0  ;;  %p378_p1 = scmp.lt.u32.totalorder %s376_s3, %s371_s28 }
  0x34   : > { %p374_p5 = pnand %p373_p3, %p372_p0  ;;  %p380_p4 = scmp.lt.u32.totalorder %s371_s28, %s596_s19 }
  0x35   : > { %p379_p2 = por %p378_p1, %p377_p10 }
  0x36   : > { %p375_p7 = pneg %p374_p5 }
  0x37   : > { %p381_p6 = por %p380_p4, %p379_p2 }
  0x39   : > { %p382_p9 = pnand %p381_p6, %p375_p7 }
  0x3b   : > { %385 = shalt.err (!%p382_p9)
}
  0x3c   : > { %s386_s6 = scalar_lea.vmem %s602_s24, 128  ;;  %s474_s14 = smov [#allocation2]  }
  0x3d   : > { %p387_p12 = scmp.ne.s32.totalorder %s602_s24, %s386_s6  ;;  %s391_s18 = sshll.u32 %s474_s14, 4  ;;  %s392_s18 = int_to_ptr.vmem [resolvable:$false] %s391_s18 }
  0x3e   : > { %s393_s21 = scalar_lea.vmem %s392_s18, 256  ;;  %p394_p5 = scmp.lt.s32.totalorder %s602_s24, %s392_s18 }
  0x3f   : > { %p389_p13 = pnand %p387_p12, %p373_p3  ;;  %p395_p10 = scmp.lt.s32.totalorder %s393_s21, %s386_s6 }
  0x41   : > { %p390_p0 = pneg %p389_p13  ;;  %p396_p1 = por %p395_p10, %p394_p5 }
  0x43   : > { %p397_p2 = pnand %p396_p1, %p390_p0 }
  0x45   : > { %400 = shalt.err (!%p397_p2)
}
  0x46   : > { %301 = dma.hbm_to_vmem [thread:$0]  (!%p598_p11), %s596_s19, 128, %s602_s24, %s122_s27  }
  0x47   : > { %p710_p7 = scmp.ne.s32.totalorder %s701_s17, 0 }
  0x48   : > { %s632_s22 = sand.u32 (!%p710_p7), 1, %s463_s10   ;;  %p711_p3 = scmp.ne.s32.totalorder (!%p710_p7), %s699_s15, 0 }
  0x49   : > { %141 = sbr.rel (%p710_p7) target bundleno = 109 (0x6d), region = 28  ;;  %s279_s25 = sshll.u32 (!%p710_p7), %s632_s22, 3 }
  0x4a   : > { %s144_s23 = scalar_lea.sflag (!%p710_p7), [#allocation3], %s632_s22  ;;  %s147_s28 = scalar_lea.vmem (!%p710_p7), [#allocation2], %s279_s25 }
  0x50   : > { %446 = dma.done.wait (%p711_p3), %s144_s23, 128  }
  0x51   : > { %448 = vsyncadd (%p711_p3), %s144_s23, 4294967168  ;;  %p712_p4 = scmp.eq.s32.totalorder %s512_s13, 0 }
  0x53   : > { %450 = dma.done.wait (%p712_p4), [#allocation6], 128   ;;  %p713_p11 = pmov %p712_p4 }
  0x54   : > { %s281_s17 = sshll.u32 %s632_s22, 2  ;;  %v172_v0 = vld [vmem:[%s147_s28] sm:$0xff]  ;;  %v173_v1 = vld [vmem:[#allocation5] sm:$0xff]  ;;  %s283_s26 = sshll.u32 %s512_s13, 6  ;;  %vm176_vm0 = vcmask 257024  }
  0x55   : > { %452 = vsyncadd (%p713_p11), [#allocation6], 4294967168  ;;  %s171_s19 = scalar_lea.vmem [#allocation7], %s281_s17  ;;  %v174_v2 = vadd.f32 %v173_v1, %v172_v0  ;;  %s651_s29 = scalar_lea.hbm %s695_s2, %s283_s26 }
  0x56   : > { %s192_s24 = sshll.u32 %s171_s19, 4  ;;  %s179_s30 = scalar_lea.sflag [#allocation4], %s632_s22  ;;  %s646_s24 = int_to_ptr.vmem [resolvable:$true] %s192_s24 }
  0x57   : > { %v175_v3 = vpack.c.bf16 %v174_v2, %v174_v2  ;;  %s401_s3 = scalar_lea.vmem %s646_s24, 64  ;;  %s475_s13 = smov [#allocation7]  }
  0x58   : > { %p402_p6 = scmp.ne.s32.totalorder %s646_s24, %s401_s3  ;;  %s405_s4 = sshll.u32 %s475_s13, 4  ;;  %s406_s4 = int_to_ptr.vmem [resolvable:$false] %s405_s4 }
  0x59   : > { %177 = vst.msk [vmem:[%s171_s19] sm:$0xf] %vm176_vm0, %v175_v3  ;;  %s407_s5 = scalar_lea.vmem %s406_s4, 128  ;;  %p408_p13 = scmp.lt.s32.totalorder %s646_s24, %s406_s4 }
  0x5a   : > { %p403_p9 = pnand %p402_p6, %p583_p8  ;;  %p409_p0 = scmp.lt.s32.totalorder %s407_s5, %s401_s3 }
  0x5c   : > { %p404_p12 = pneg %p403_p9  ;;  %p410_p5 = por %p409_p0, %p408_p13 }
  0x5e   : > { %p411_p10 = pnand %p410_p5, %p404_p12 }
  0x60   : > { %414 = shalt.err (!%p411_p10)
}
  0x61   : > { %s415_s6 = scalar_lea.hbm %s651_s29, 64  ;;  %s419_s21 = scalar_lea.hbm %s695_s2, 128 }
  0x62   : > { %p416_p1 = scmp.ne.s32.totalorder %s651_s29, %s415_s6  ;;  %p420_p3 = scmp.lt.u32.totalorder %s651_s29, %s695_s2 }
  0x63   : > { %p421_p4 = scmp.lt.u32.totalorder %s419_s21, %s415_s6  ;;  %p423_p6 = scmp.lt.u32.totalorder %s415_s6, %s651_s29 }
  0x64   : > { %p417_p2 = pnand %p416_p1, %p583_p8 }
  0x65   : > { %p422_p11 = por %p421_p4, %p420_p3 }
  0x66   : > { %p418_p7 = pneg %p417_p2 }
  0x67   : > { %p424_p9 = por %p423_p6, %p422_p11 }
  0x69   : > { %p425_p12 = pnand %p424_p9, %p418_p7 }
  0x6b   : > { %428 = shalt.err (!%p425_p12)
}
  0x6c   : > { %292 = dma.vmem_to_hbm [thread:$0]  (%p583_p8), %s646_s24, 64, %s651_s29, %s179_s30  }
  0x6d PF: > { %s204_s23 = sand.u32 1, %s459_s9   ;;  %p714_p13 = scmp.ne.s32.totalorder %s700_s16, 0 }
  0x6e   : > { %p715_p0 = scmp.ge.s32.totalorder %s471_s12, 2  ;;  %s205_s28 = scalar_lea.sflag [#allocation4], %s204_s23 }
  0x70   : > { %p303_p5 = pnand %p715_p0, %p714_p13 }
  0x72   : > { %454 = dma.done.wait (!%p303_p5), %s205_s28, 64  }
  0x73   : > { %456 = vsyncadd (!%p303_p5), %s205_s28, 4294967232  ;;  %p16_p10 = scmp.ge.s32.totalorder %s539_s20, 4   ;;  %s716_s9 = smov %s463_s10 }
  0x74   : > { %s717_s10 = smov %s467_s11  ;;  %s718_s11 = smov %s575_s7 }
  0x75   : > { %s719_s12 = smov %s539_s20  ;;  %18 = sbr.rel (!%p16_p10) target bundleno = 6 (0x6), region = 77 }
  0x7c   :  { %210 = vsyncpa [#allocation3], 1 }
  0x7d   :  { %212 = vsyncpa [#allocation3 + $0x1], 1 }
  0x7e   :  { %213 = vsyncpa [#allocation6], 1 }
  0x7f   :  { %214 = vsyncpa [#allocation4], 1 }
  0x80   :  { %216 = vsyncpa [#allocation4 + $0x1], 1 }

</bundles_post_ra>
